<compile_context>
chip_gen: v7x
topology: tpu7x:2x2x1
jax: 0.10.0
libtpu: 0.0.40
codegen_flags: <defaults>
</compile_context>

<pallas_src>
import jax
import jax.numpy as jnp
from jax.experimental import pallas as pl
from jax.experimental.pallas import tpu as pltpu


# ----------------------------- Pallas kernel -------------------------------

def _dcd_kernel(x1_ref, xm_ref, w1_ref, b1_ref, w2_ref, b2_ref, o_ref):
    """Channel-major fused 1x1-conv (folded BN) + SiLU for both DCDConv branches.

    x1_ref : (1, 4*ch, tm) bf16   space-to-depth slab of the first input half
    xm_ref : (1,   ch, tm) f32    3x3/s2 max-pooled second half (cast to bf16 here)
    w1_ref : (cout, 4*ch)  bf16   Focus conv weight (BN folded), resident
    w2_ref : (cout,   ch)  bf16   cv2   conv weight (BN folded), resident
    b1_ref / b2_ref : (cout, 1) f32
    o_ref  : (1, 2*cout, tm) f32  final channel-major output tile (lanes = spatial)
    """
    cout = w1_ref.shape[0]

    # Branch 1: Focus (space-to-depth done in wrapper) -> folded-BN 1x1 conv -> SiLU.
    y1 = jnp.dot(w1_ref[...], x1_ref[0], preferred_element_type=jnp.float32)
    y1 = y1 + b1_ref[...]
    y1 = y1 * jax.nn.sigmoid(y1)                       # SiLU
    o_ref[0, :cout, :] = y1.astype(o_ref.dtype)        # lane-dense store

    # Branch 2: (3x3/s2 max-pool in wrapper) -> folded-BN 1x1 conv -> SiLU -> SiLU.
    x2 = xm_ref[0].astype(jnp.bfloat16)                # exact cast of pooled values, in VMEM
    y2 = jnp.dot(w2_ref[...], x2, preferred_element_type=jnp.float32)
    y2 = y2 + b2_ref[...]
    y2 = y2 * jax.nn.sigmoid(y2)                       # SiLU (inside Conv block)
    y2 = y2 * jax.nn.sigmoid(y2)                       # SiLU (self.module)
    o_ref[0, cout:, :] = y2.astype(o_ref.dtype)        # lane-dense store


# ------------------------------- sizing helpers ------------------------------

def _vmem_budgets():
    """Generation-aware (tile budget, compiler vmem limit) in bytes."""
    try:
        cap = int(pltpu.get_tpu_info().vmem_capacity_bytes)
        budget = int(cap * 0.6)
        limit = min(int(cap * 0.75), cap - (8 << 20))
        return budget, int(limit)
    except Exception:
        # Conservative defaults, safe on v7x (64 MiB physical VMEM per TC).
        return 40 << 20, 48 << 20


def _tile_vmem_bytes(tm, ch, cout):
    """Rough double-buffered VMEM footprint of one grid step."""
    acts = tm * (4 * ch * 2 + ch * 4)            # bf16 x1 slab + f32 pooled slab
    outs = tm * 2 * cout * 4                     # f32 output tile
    wts = (4 * ch + ch) * cout * 2 + 2 * cout * 4
    return 2 * (acts + outs) + 2 * wts


def _pick_tile(S, N, ch, cout, budget, tm_max=2048):
    """Spatial (lane-dim) tile: multiple of 128 or the full extent; fits VMEM budget."""
    if S < 256:
        return S                                  # full extent per image
    tm = (min(tm_max, S) // 128) * 128
    while tm > 128 and _tile_vmem_bytes(tm, ch, cout) > budget:
        tm -= 128
    if N == 1:
        # Keep >= 2 grid steps so the parallel axes can actually use both TCs / megacore.
        while tm > 128 and pl.cdiv(S, tm) < 2:
            tm = max(128, ((tm // 2) // 128) * 128)
    return tm


# ------------------------------- wrapper ------------------------------------

def dcdconv_forward(x_nchw, params):
    """x_nchw: (N, c1, H, W) float32. Returns (N, c2, H//2, W//2) float32 (NCHW)."""
    N, c1, H, W = x_nchw.shape
    assert c1 % 2 == 0 and H % 2 == 0 and W % 2 == 0, "even channels / spatial assumed"
    ch = c1 // 2
    cout = params["w1"].shape[1]                  # c2 // 2
    Ho, Wo = H // 2, W // 2
    S = Ho * Wo

    # avg_pool2d(x, 1, 1, 0) is the identity.
    x1 = x_nchw[:, :ch]
    x2 = x_nchw[:, ch:]

    # Focus space-to-depth, channel-major, concat order (tl, bl, tr, br):
    #   combined channel index = (2*wx + hy)*ch + c, spatial flattened to ho*Wo + wo.
    x1s = jnp.transpose(x1.reshape(N, ch, Ho, 2, Wo, 2), (0, 5, 3, 1, 2, 4))
    x1s = x1s.reshape(N, 4 * ch, S).astype(jnp.bfloat16)

    # 3x3 / stride-2 / pad-1 max-pool directly on NCHW f32: output is already
    # channel-major, the reshape below is free, and the bf16 cast happens in-kernel.
    xm = jax.lax.reduce_window(
        x2, -jnp.inf, jax.lax.max,
        window_dimensions=(1, 1, 3, 3),
        window_strides=(1, 1, 2, 2),
        padding=((0, 0), (0, 0), (1, 1), (1, 1))).reshape(N, ch, S)

    # Folded-BN weights, channel-major orientation; biases / epilogue stay f32.
    w1 = params["w1"].T.astype(jnp.bfloat16)      # (cout, 4*ch)
    w2 = params["w2"].T.astype(jnp.bfloat16)      # (cout, ch)
    b1 = params["b1"].T.astype(jnp.float32)       # (cout, 1)
    b2 = params["b2"].T.astype(jnp.float32)       # (cout, 1)

    budget, vmem_limit = _vmem_budgets()
    tm = _pick_tile(S, N, ch, cout, budget)
    grid = (N, pl.cdiv(S, tm))                    # ragged last block masked by Pallas

    flops = 2 * N * S * (5 * ch) * cout
    transcendentals = 3 * N * S * cout
    bytes_accessed = (N * S * (4 * ch * 2 + ch * 4 + 2 * cout * 4)
                      + 5 * ch * cout * 2 + 2 * cout * 4)

    out = pl.pallas_call(
        _dcd_kernel,
        out_shape=jax.ShapeDtypeStruct((N, 2 * cout, S), jnp.float32),
        grid_spec=pltpu.PrefetchScalarGridSpec(
            num_scalar_prefetch=0,
            grid=grid,
            in_specs=[
                pl.BlockSpec((1, 4 * ch, tm), lambda n, m: (n, 0, m)),   # x1 slab
                pl.BlockSpec((1, ch, tm), lambda n, m: (n, 0, m)),       # pooled x2
                pl.BlockSpec((cout, 4 * ch), lambda n, m: (0, 0)),       # w1, resident
                pl.BlockSpec((cout, 1), lambda n, m: (0, 0)),            # b1
                pl.BlockSpec((cout, ch), lambda n, m: (0, 0)),           # w2, resident
                pl.BlockSpec((cout, 1), lambda n, m: (0, 0)),            # b2
            ],
            out_specs=pl.BlockSpec((1, 2 * cout, tm), lambda n, m: (n, 0, m)),
        ),
        compiler_params=pltpu.CompilerParams(
            dimension_semantics=("parallel", "parallel"),
            vmem_limit_bytes=int(vmem_limit)),
        cost_estimate=pl.CostEstimate(
            flops=flops, transcendentals=transcendentals,
            bytes_accessed=bytes_accessed),
    )(x1s, xm, w1, b1, w2, b2)

    # (N, 2*cout, Ho*Wo) -> (N, 2*cout, Ho, Wo): row-major reshape, no data movement.
    return out.reshape(N, 2 * cout, Ho, Wo)


# ------------------------- params & pure-JAX reference ----------------------

def init_params(key, c1, c2, eps=1e-5):
    """Deterministic synthetic weights; eval-mode BatchNorm folded into the 1x1 convs."""
    ch = c1 // 2
    cout = c2 // 2
    ks = jax.random.split(key, 10)

    # Focus.conv (BaseConv): Conv2d(4*ch, cout, k=1) + BN(cout)
    wf = jax.random.normal(ks[0], (cout, 4 * ch), jnp.float32) * 0.2
    gf = 1.0 + 0.1 * jax.random.normal(ks[1], (cout,), jnp.float32)
    bf = 0.1 * jax.random.normal(ks[2], (cout,), jnp.float32)
    mf = 0.1 * jax.random.normal(ks[3], (cout,), jnp.float32)
    vf = 1.0 + 0.1 * jnp.abs(jax.random.normal(ks[4], (cout,), jnp.float32))
    sf = gf / jnp.sqrt(vf + eps)
    w1 = (wf * sf[:, None]).T                    # (4*ch, cout)
    b1 = (bf - mf * sf)[None, :]                 # (1, cout)

    # cv2 (Conv): Conv2d(ch, cout, k=1) + BN(cout)
    wc = jax.random.normal(ks[5], (cout, ch), jnp.float32) * 0.2
    gc = 1.0 + 0.1 * jax.random.normal(ks[6], (cout,), jnp.float32)
    bc = 0.1 * jax.random.normal(ks[7], (cout,), jnp.float32)
    mc = 0.1 * jax.random.normal(ks[8], (cout,), jnp.float32)
    vc = 1.0 + 0.1 * jnp.abs(jax.random.normal(ks[9], (cout,), jnp.float32))
    sc = gc / jnp.sqrt(vc + eps)
    w2 = (wc * sc[:, None]).T                    # (ch, cout)
    b2 = (bc - mc * sc)[None, :]                 # (1, cout)

    return dict(w1=w1, b1=b1, w2=w2, b2=b2)


def dcdconv_reference(x, params, bf16_operands=False):
    """Pure-JAX reference (NCHW) mirroring the PyTorch forward.

    bf16_operands=True rounds the matmul operands to bf16 (as the kernel does) but
    performs the dots in f32 — same products, universally-supported dtype combo.
    """
    def rnd(a):
        return a.astype(jnp.bfloat16).astype(jnp.float32) if bf16_operands else a

    N, c1, H, W = x.shape
    ch = c1 // 2
    x1, x2 = x[:, :ch], x[:, ch:]
    tl = x1[..., ::2, ::2]
    tr = x1[..., ::2, 1::2]
    bl = x1[..., 1::2, ::2]
    br = x1[..., 1::2, 1::2]
    xs = rnd(jnp.concatenate([tl, bl, tr, br], axis=1))
    y1 = jnp.einsum("nchw,co->nohw", xs, rnd(params["w1"])) \
        + params["b1"][0][None, :, None, None]
    y1 = y1 * jax.nn.sigmoid(y1)

    xp = jax.lax.reduce_window(
        x2, -jnp.inf, jax.lax.max,
        window_dimensions=(1, 1, 3, 3),
        window_strides=(1, 1, 2, 2),
        padding=((0, 0), (0, 0), (1, 1), (1, 1)))
    xp = rnd(xp)
    y2 = jnp.einsum("nchw,co->nohw", xp, rnd(params["w2"])) \
        + params["b2"][0][None, :, None, None]
    y2 = y2 * jax.nn.sigmoid(y2)
    y2 = y2 * jax.nn.sigmoid(y2)
    return jnp.concatenate([y1, y2], axis=1)


# ---------------------------------- test -------------------------------------

if __name__ == "__main__":
    key = jax.random.PRNGKey(0)
    k_x, k_p = jax.random.split(key)

    N, c1, c2, H, W = 2, 4, 8, 16, 16
    x = jax.random.normal(k_x, (N, c1, H, W), dtype=jnp.float32)
    params = init_params(k_p, c1, c2)

    out = jax.block_until_ready(dcdconv_forward(x, params))
    assert out.shape == (N, c2, H // 2, W // 2), out.shape

    # Tight check vs a reference using bf16-rounded operands (dots done in f32).
    ref_bf16 = dcdconv_reference(x, params, bf16_operands=True)
    assert jnp.allclose(out, ref_bf16, rtol=2e-3, atol=2e-3), \
        float(jnp.max(jnp.abs(out - ref_bf16)))

    # Loose check vs the exact-f32 path (PyTorch-equivalent); only bf16 operand
    # rounding differs.
    ref_f32 = dcdconv_reference(x, params, bf16_operands=False)
    assert jnp.allclose(out, ref_f32, rtol=5e-2, atol=5e-2), \
        float(jnp.max(jnp.abs(out - ref_f32)))

    print("KERNEL_OK")
</pallas_src>

<mosaic_0001>
module attributes {stable_mosaic.version = 11 : i64} {
  func.func @_dcd_kernel(%arg0: i32, %arg1: i32, %arg2: memref<1x8x64xbf16, #tpu.memory_space<vmem>>, %arg3: memref<1x2x64xf32, #tpu.memory_space<vmem>>, %arg4: memref<4x8xbf16, #tpu.memory_space<vmem>>, %arg5: memref<4x1xf32, #tpu.memory_space<vmem>>, %arg6: memref<4x2xbf16, #tpu.memory_space<vmem>>, %arg7: memref<4x1xf32, #tpu.memory_space<vmem>>, %arg8: memref<1x8x64xf32, #tpu.memory_space<vmem>>) attributes {dimension_semantics = [#tpu.dimension_semantics<parallel>, #tpu.dimension_semantics<parallel>], iteration_bounds = array<i64: 2, 1>, scalar_prefetch = 0 : i64, scratch_operands = 0 : i64, tpu.core_type = #tpu.core_type<tc>, window_params = [{transform_indices = @transform_0, window_bounds = array<i64: 1, 8, 64>}, {transform_indices = @transform_1, window_bounds = array<i64: 1, 2, 64>}, {pipeline_mode = #tpu.pipeline_mode<synchronous>, transform_indices = @transform_2, window_bounds = array<i64: 4, 8>}, {pipeline_mode = #tpu.pipeline_mode<synchronous>, transform_indices = @transform_3, window_bounds = array<i64: 4, 1>}, {pipeline_mode = #tpu.pipeline_mode<synchronous>, transform_indices = @transform_4, window_bounds = array<i64: 4, 2>}, {pipeline_mode = #tpu.pipeline_mode<synchronous>, transform_indices = @transform_5, window_bounds = array<i64: 4, 1>}, {transform_indices = @transform_6, window_bounds = array<i64: 1, 8, 64>}]} {
    %c0 = arith.constant 0 : index
    %c0_0 = arith.constant 0 : index
    %0 = vector.load %arg4[%c0, %c0_0] : memref<4x8xbf16, #tpu.memory_space<vmem>>, vector<4x8xbf16>
    %c0_1 = arith.constant 0 : index
    %c0_2 = arith.constant 0 : index
    %c0_3 = arith.constant 0 : index
    %1 = vector.load %arg2[%c0_1, %c0_2, %c0_3] : memref<1x8x64xbf16, #tpu.memory_space<vmem>>, vector<1x8x64xbf16>
    %2 = vector.shape_cast %1 : vector<1x8x64xbf16> to vector<8x64xbf16>
    %cst = arith.constant dense<0.000000e+00> : vector<4x64xf32>
    %3 = tpu.matmul %0, %2, %cst {dimension_numbers = #tpu.dot_dimension_numbers<[1], [0], [0], [1], [0, 0, 1, 1], [], []>} : vector<4x8xbf16>, vector<8x64xbf16>, vector<4x64xf32> -> vector<4x64xf32>
    %c0_4 = arith.constant 0 : index
    %c0_5 = arith.constant 0 : index
    %4 = vector.load %arg5[%c0_4, %c0_5] : memref<4x1xf32, #tpu.memory_space<vmem>>, vector<4x1xf32>
    %5 = vector.broadcast %4 : vector<4x1xf32> to vector<4x64xf32>
    %6 = arith.addf %3, %5 : vector<4x64xf32>
    %7 = arith.negf %6 : vector<4x64xf32>
    %8 = math.exp %7 : vector<4x64xf32>
    %cst_6 = arith.constant 1.000000e+00 : f32
    %9 = vector.broadcast %cst_6 : f32 to vector<4x64xf32>
    %10 = arith.addf %9, %8 : vector<4x64xf32>
    %11 = arith.divf %9, %10 : vector<4x64xf32>
    %12 = arith.mulf %6, %11 : vector<4x64xf32>
    %c0_7 = arith.constant 0 : index
    %c0_8 = arith.constant 0 : index
    %c0_9 = arith.constant 0 : index
    %13 = vector.load %arg8[%c0_7, %c0_8, %c0_9] : memref<1x8x64xf32, #tpu.memory_space<vmem>>, vector<1x4x64xf32>
    %14 = vector.shape_cast %13 : vector<1x4x64xf32> to vector<4x64xf32>
    %15 = vector.shape_cast %12 : vector<4x64xf32> to vector<1x4x64xf32>
    tpu.vector_store %arg8[%c0_7, %c0_8, %c0_9], %15 {strides = array<i32>} : memref<1x8x64xf32, #tpu.memory_space<vmem>>, vector<1x4x64xf32>,
    %c0_10 = arith.constant 0 : index
    %c0_11 = arith.constant 0 : index
    %c0_12 = arith.constant 0 : index
    %16 = vector.load %arg3[%c0_10, %c0_11, %c0_12] : memref<1x2x64xf32, #tpu.memory_space<vmem>>, vector<1x2x64xf32>
    %17 = vector.shape_cast %16 : vector<1x2x64xf32> to vector<2x64xf32>
    %18 = arith.truncf %17 : vector<2x64xf32> to vector<2x64xbf16>
    %c0_13 = arith.constant 0 : index
    %c0_14 = arith.constant 0 : index
    %19 = vector.load %arg6[%c0_13, %c0_14] : memref<4x2xbf16, #tpu.memory_space<vmem>>, vector<4x2xbf16>
    %cst_15 = arith.constant dense<0.000000e+00> : vector<4x64xf32>
    %20 = tpu.matmul %19, %18, %cst_15 {dimension_numbers = #tpu.dot_dimension_numbers<[1], [0], [0], [1], [0, 0, 1, 1], [], []>} : vector<4x2xbf16>, vector<2x64xbf16>, vector<4x64xf32> -> vector<4x64xf32>
    %c0_16 = arith.constant 0 : index
    %c0_17 = arith.constant 0 : index
    %21 = vector.load %arg7[%c0_16, %c0_17] : memref<4x1xf32, #tpu.memory_space<vmem>>, vector<4x1xf32>
    %22 = vector.broadcast %21 : vector<4x1xf32> to vector<4x64xf32>
    %23 = arith.addf %20, %22 : vector<4x64xf32>
    %24 = arith.negf %23 : vector<4x64xf32>
    %25 = math.exp %24 : vector<4x64xf32>
    %cst_18 = arith.constant 1.000000e+00 : f32
    %26 = vector.broadcast %cst_18 : f32 to vector<4x64xf32>
    %27 = arith.addf %26, %25 : vector<4x64xf32>
    %28 = arith.divf %26, %27 : vector<4x64xf32>
    %29 = arith.mulf %23, %28 : vector<4x64xf32>
    %30 = arith.negf %29 : vector<4x64xf32>
    %31 = math.exp %30 : vector<4x64xf32>
    %cst_19 = arith.constant 1.000000e+00 : f32
    %32 = vector.broadcast %cst_19 : f32 to vector<4x64xf32>
    %33 = arith.addf %32, %31 : vector<4x64xf32>
    %34 = arith.divf %32, %33 : vector<4x64xf32>
    %35 = arith.mulf %29, %34 : vector<4x64xf32>
    %c0_20 = arith.constant 0 : index
    %c4 = arith.constant 4 : index
    %c0_21 = arith.constant 0 : index
    %36 = vector.load %arg8[%c0_20, %c4, %c0_21] : memref<1x8x64xf32, #tpu.memory_space<vmem>>, vector<1x4x64xf32>
    %37 = vector.shape_cast %36 : vector<1x4x64xf32> to vector<4x64xf32>
    %38 = vector.shape_cast %35 : vector<4x64xf32> to vector<1x4x64xf32>
    tpu.vector_store %arg8[%c0_20, %c4, %c0_21], %38 {strides = array<i32>} : memref<1x8x64xf32, #tpu.memory_space<vmem>>, vector<1x4x64xf32>,
    return
  }
  func.func @transform_0(%arg0: i32, %arg1: i32) -> (i32, i32, i32) {
    %c0_i32 = arith.constant 0 : i32
    %c0_i32_0 = arith.constant 0 : i32
    return %arg0, %c0_i32, %arg1 : i32, i32, i32
  }
  func.func @transform_1(%arg0: i32, %arg1: i32) -> (i32, i32, i32) {
    %c0_i32 = arith.constant 0 : i32
    %c0_i32_0 = arith.constant 0 : i32
    return %arg0, %c0_i32, %arg1 : i32, i32, i32
  }
  func.func @transform_2(%arg0: i32, %arg1: i32) -> (i32, i32) {
    %c0_i32 = arith.constant 0 : i32
    %c0_i32_0 = arith.constant 0 : i32
    %c0_i32_1 = arith.constant 0 : i32
    return %c0_i32, %c0_i32_0 : i32, i32
  }
  func.func @transform_3(%arg0: i32, %arg1: i32) -> (i32, i32) {
    %c0_i32 = arith.constant 0 : i32
    %c0_i32_0 = arith.constant 0 : i32
    %c0_i32_1 = arith.constant 0 : i32
    return %c0_i32, %c0_i32_0 : i32, i32
  }
  func.func @transform_4(%arg0: i32, %arg1: i32) -> (i32, i32) {
    %c0_i32 = arith.constant 0 : i32
    %c0_i32_0 = arith.constant 0 : i32
    %c0_i32_1 = arith.constant 0 : i32
    return %c0_i32, %c0_i32_0 : i32, i32
  }
  func.func @transform_5(%arg0: i32, %arg1: i32) -> (i32, i32) {
    %c0_i32 = arith.constant 0 : i32
    %c0_i32_0 = arith.constant 0 : i32
    %c0_i32_1 = arith.constant 0 : i32
    return %c0_i32, %c0_i32_0 : i32, i32
  }
  func.func @transform_6(%arg0: i32, %arg1: i32) -> (i32, i32, i32) {
    %c0_i32 = arith.constant 0 : i32
    %c0_i32_0 = arith.constant 0 : i32
    return %arg0, %c0_i32, %arg1 : i32, i32, i32
  }
}

</mosaic_0001>

<bundles_post_ra>
// kernel: tpu_custom_call.1
= control target key start
LH: loop header
LB: loop body
LE: loop exit
PB: predicated region body
PF: predicated region fallthrough
CT: control target
= control target key end

     0   :  { %11 = vsyncpa [#allocation3], 0  ;;  %s891_s0 = inlined_call_operand.vmem [shape: bf16[2,8,64], index: 0, kind: input, shape index: {}]   ;;  %s892_s1 = inlined_call_operand.vmem [shape: f32[2,2,64], index: 1, kind: input, shape index: {}]   ;;  %s893_s2 = inlined_call_operand.vmem [shape: bf16[4,8], index: 2, kind: input, shape index: {}]   ;;  %s894_s3 = inlined_call_operand.vmem [shape: f32[4,1], index: 3, kind: input, shape index: {}]   ;;  %s895_s4 = inlined_call_operand.vmem [shape: bf16[4,2], index: 4, kind: input, shape index: {}]   ;;  %s896_s5 = inlined_call_operand.vmem [shape: f32[4,1], index: 5, kind: input, shape index: {}]   ;;  %s897_s6 = inlined_call_operand.hbm [shape: f32[2,8,64], index: 6, kind: output, shape index: {}]  }
   0x1   :  { %13 = vsyncpa [#allocation3 + $0x1], 0  ;;  %s762_s21 = smov 0   ;;  %s764_s22 = smov 0  }
   0x2   :  { %s766_s23 = smov 0   ;;  %s768_s24 = smov 0  }
   0x3   :  { %s770_s25 = smov 0   ;;  %s772_s26 = smov 0  }
   0x4 LB: > { %s539_s27 = sadd.s32 4294967295, %s721_s26   ;;  %s540_s28 = sadd.s32 4294967294, %s721_s26   ;;  %s721_s26 = sphi %s772_s26, %s19_s26   ;;  %s717_s25 = sphi %s770_s25, %s904_s25   ;;  %s713_s24 = sphi %s768_s24, %s903_s24   ;;  %s709_s23 = sphi %s766_s23, %s902_s23   ;;  %s705_s22 = sphi %s764_s22, %s901_s22   ;;  %s701_s21 = sphi %s762_s21, %s900_s21  }
   0x5   : > { %s31_s29 = sadd.s32 1, %s717_s25  ;;  %s180_s30 = sadd.s32 1, %s709_s23 }
   0x6   : > { %p33_p0 = scmp.ge.s32.totalorder %s31_s29, 2  ;;  %p190_p1 = scmp.ne.s32.totalorder %s709_s23, %s705_s22 }
   0x7   : > { %p191_p2 = scmp.eq.s32.totalorder %s539_s27, 1  ;;  %p196_p3 = scmp.ne.s32.totalorder %s705_s22, %s701_s21 }
   0x8   : > { %s906_s29 = smov (%p33_p0, %s31_s29), 0  ;;  %p197_p5 = scmp.eq.s32.totalorder %s540_s28, 1 }
   0x9   : > { %p802_p4 = por %p191_p2, %p190_p1  ;;  %s175_s8 = ssub.s32 %s717_s25, %s906_s29 }
   0xa   : > { %p543_p6 = scmp.ge.s32.totalorder %s721_s26, 1  ;;  %p178_p7 = scmp.eq.s32.totalorder %s175_s8, 0 }
   0xb   : > { %p809_p8 = por %p197_p5, %p196_p3  ;;  %p247_p9 = scmp.lt.s32.totalorder %s721_s26, 3 }
   0xc   : > { %s815_s10 = scalar_select %p178_p7, %s709_s23, %s180_s30  }
   0xd   : > { %p248_p10 = pnand %p543_p6, %p247_p9 }
   0xe   : > { %p286_p11 = scmp.lt.s32.totalorder (!%p248_p10), %s713_s24, 1  ;;  %v723_v0 = vmov (!%p248_p10), 0.0   ;;  %vm724_vm0 = vmmov (!%p248_p10), 0   ;;  %v369_v1 = vld [vmem:[%s896_s5] sm:$0xf] (!%p248_p10)  ;;  %v725_v2 = vmov (!%p248_p10), 0  }
   0xf   : > { %251 = sbr.rel (%p248_p10) target bundleno = 318 (0x13e), region = 44  ;;  %560 = vmatprep.subr.bf16.mxu0 (!%p248_p10), %v723_v0  ;;  %566 = vmatprep.subr.bf16.mxu1 (!%p248_p10), %v723_v0  ;;  %vm313_vm1 = vcmask (!%p248_p10), 1043456   ;;  %v303_v3 = vld [vmem:[%s894_s3] sm:$0xf] (!%p248_p10)  ;;  %vm379_vm2 = vcmask (!%p248_p10), 1040384   ;;  %vm309_vm3 = vcmask (!%p248_p10), 64512  }
  0x10   : > { %562 = vmatprep.mubr.msk.bf16.mxu0 (!%p248_p10), %vm724_vm0, %v723_v0  ;;  %568 = vmatprep.mubr.msk.bf16.mxu1 (!%p248_p10), %vm724_vm0, %v723_v0  ;;  %v301_v8 = vld [vmem:[%s893_s2] sm:$0x3] (!%p248_p10)  ;;  %vm375_vm4 = vcmask (!%p248_p10), 15360   ;;  %vm364_vm5 = vcmask (!%p248_p10), 519168   ;;  %s553_s17 = sshll.u32 (!%p248_p10), %s713_s24, 7 }
  0x11   : > { %630 = vset.pattern.permute.xlu0 (!%p248_p10), %v725_v2  ;;  %v368_v10 = vld [vmem:[%s895_s4] sm:$0x3] (!%p248_p10) }
  0x12   : > { %372 = vperm.xlu0 (!%p248_p10), %630, %v369_v1  }
  0x16   : > { %s287_s11 = scalar_select %p286_p11, %s713_s24, 1  ;;  %306 = vperm.xlu0 %630, %v303_v3  }
  0x17   : > { %s726_s24 = smov [#allocation2]  }
  0x18   : > { %s545_s14 = sshll.u32 %s287_s11, 2  ;;  %s546_s15 = sshll.u32 %s287_s11, 1 }
  0x19   : > { %s292_s18 = scalar_lea.vmem %s891_s0, %s545_s14  ;;  %s299_s27 = scalar_lea.vmem %s892_s1, %s546_s15 }
  0x1a   : > { %v302_v4 = vld [vmem:[%s292_s18] sm:$0xf]  ;;  %s283_s14 = sand.u32 1, %s705_s22   ;;  %s647_s8 = sshll.u32 %s726_s24, 4  ;;  %s648_s8 = int_to_ptr.vmem [resolvable:$false] %s647_s8 }
  0x1b   : > { %v366_v5 = vld [vmem:[%s299_s27] sm:$0x3]  ;;  %v315_v6 = vsel %vm313_vm1, %v302_v4, 0  ;;  %s544_s15 = sshll.u32 %s283_s14, 3  ;;  %s843_s27 = scalar_lea.hbm %s897_s6, %s553_s17 }
  0x1c   : > { %v367_v7 = vpack.c.bf16 %v366_v5, %v366_v5  ;;  %561 = vmatpush3.bf16.msra.mxu0 %v315_v6  ;;  %s285_s16 = scalar_lea.vmem [#allocation2], %s544_s15  ;;  %s439_s28 = scalar_lea.sflag [#allocation3], %s283_s14 }
  0x1d   : > { %s453_s18 = sshll.u32 %s285_s16, 4  ;;  %s649_s11 = scalar_lea.vmem %s648_s8, 256  ;;  %s845_s18 = int_to_ptr.vmem [resolvable:$true] %s453_s18 }
  0x1e   : > { %v381_v9 = vsel %vm379_vm2, %v367_v7, 0  ;;  %s643_s30 = scalar_lea.vmem %s845_s18, 128  ;;  %p650_p1 = scmp.lt.s32.totalorder %s845_s18, %s648_s8 }
  0x1f   : > { %567 = vmatpush3.bf16.msra.mxu1 %v381_v9  ;;  %563 = vmatmul.mubr.msk.bf16.vlgmr.msra.gmra.mrb[0].mxu0 %vm309_vm3, %v301_v8  ;;  %p644_p12 = scmp.ne.s32.totalorder %s845_s18, %s643_s30  ;;  %p651_p2 = scmp.lt.s32.totalorder %s649_s11, %s643_s30 }
  0x21   : > { %p645_p13 = pnand %p644_p12, %p802_p4  ;;  %p652_p3 = por %p651_p2, %p650_p1 }
  0x22   : > { %569 = vmatmul.mubr.msk.bf16.vlgmr.msra.gmra.mrb[0].mxu1 %vm375_vm4, %v368_v10 }
  0x23   : > { %p646_p0 = pneg %p645_p13 }
  0x25   : > { %p653_p5 = pnand %p652_p3, %p646_p0 }
  0x91   : > { %v373_v11 = vpop.permute.xlu0 %372 }
  0x95   : > { %v307_v12 = vpop.permute.xlu0 %306 }
  0xf2   : > { %v351_v13 = vpop.f32.mrb[0].mxu0 }
  0xf3   : > { %v352_v14 = vadd.f32 %v351_v13, %v307_v12  ;;  %v564_v15 = vpop.f32.mrb[1].mxu0 }
  0xf4   : > { %v354_v17 = vpop.f32.mrb[2].mxu0 }
  0xf5   : > { %v417_v16 = vpop.f32.mrb[0].mxu1  ;;  %v548_v18 = vmul.f32 -1.442695, %v352_v14  ;;  %v565_v21 = vpop.f32.mrb[3].mxu0 }
  0xf6   : > { %v418_v19 = vadd.f32 %v417_v16, %v373_v11  ;;  %v570_v20 = vpop.f32.mrb[1].mxu1 }
  0xf7   : > { %v420_v22 = vpop.f32.mrb[2].mxu1  ;;  %631 = vpow2.f32 %v548_v18 }
  0xf8   : > { %v550_v23 = vmul.f32 -1.442695, %v418_v19  ;;  %v571_v24 = vpop.f32.mrb[3].mxu1 }
  0xfa   : > { %633 = vpow2.f32 %v550_v23 }
 0x101   : > { %v632_v25 = vpop.eup %631 }
 0x102   : > { %v360_v26 = vadd.f32 1.0, %v632_v25 }
 0x104   : > { %v634_v27 = vpop.eup %633  ;;  %635 = vrcp.f32 %v360_v26 }
 0x105   : > { %v426_v28 = vadd.f32 1.0, %v634_v27 }
 0x107   : > { %637 = vrcp.f32 %v426_v28 }
 0x10e   : > { %v636_v29 = vpop.eup %635 }
 0x10f   : > { %v363_v30 = vmul.f32 %v636_v29, %v352_v14 }
 0x111   : > { %v638_v31 = vpop.eup %637  ;;  %365 = vst.msk [vmem:[%s285_s16] sm:$0xf] %vm364_vm5, %v363_v30 }
 0x112   : > { %v429_v32 = vmul.f32 %v638_v31, %v418_v19 }
 0x114   : > { %v551_v33 = vmul.f32 -1.442695, %v429_v32 }
 0x116   : > { %639 = vpow2.f32 %v551_v33 }
 0x120   : > { %v640_v34 = vpop.eup %639 }
 0x121   : > { %v433_v35 = vadd.f32 1.0, %v640_v34 }
 0x123   : > { %641 = vrcp.f32 %v433_v35 }
 0x12d   : > { %v642_v36 = vpop.eup %641 }
 0x12e   : > { %v436_v37 = vmul.f32 %v642_v36, %v429_v32 }
 0x130   : > { %437 = vst.msk [vmem:[%s285_s16 + $0x4] sm:$0xf] %vm364_vm5, %v436_v37 }
 0x131   : > { %656 = shalt.err (!%p653_p5)
}
 0x132   : > { %s657_s12 = scalar_lea.hbm %s843_s27, 128  ;;  %s661_s15 = scalar_lea.hbm %s897_s6, 256 }
 0x133   : > { %p658_p6 = scmp.ne.s32.totalorder %s843_s27, %s657_s12  ;;  %p662_p10 = scmp.lt.u32.totalorder %s843_s27, %s897_s6 }
 0x134   : > { %p663_p11 = scmp.lt.u32.totalorder %s661_s15, %s657_s12  ;;  %p665_p13 = scmp.lt.u32.totalorder %s657_s12, %s843_s27 }
 0x135   : > { %p659_p7 = pnand %p658_p6, %p802_p4 }
 0x136   : > { %p664_p12 = por %p663_p11, %p662_p10 }
 0x137   : > { %p660_p9 = pneg %p659_p7 }
 0x138   : > { %p666_p0 = por %p665_p13, %p664_p12 }
 0x13a   : > { %p667_p1 = pnand %p666_p0, %p660_p9 }
 0x13c   : > { %670 = shalt.err (!%p667_p1)
}
 0x13d   : > { %572 = dma.vmem_to_hbm [thread:$0]  (%p802_p4), %s845_s18, 128, %s843_s27, %s439_s28  }
 0x13e PF: > { %p578_p2 = scmp.ge.s32.totalorder %s721_s26, 2  ;;  %s465_s19 = sand.u32 1, %s701_s21  }
 0x13f   : > { %s466_s20 = scalar_lea.sflag [#allocation3], %s465_s19 }
 0x140   : > { %p575_p3 = pnand %p578_p2, %p809_p8 }
 0x142   : > { %696 = dma.done.wait (!%p575_p3), %s466_s20, 128  }
 0x143   : > { %698 = vsyncadd (!%p575_p3), %s466_s20, 4294967168  ;;  %s19_s26 = sadd.s32 1, %s721_s26   ;;  %s900_s21 = smov %s705_s22 }
 0x144   : > { %p16_p5 = scmp.ge.s32.totalorder %s19_s26, 4   ;;  %s901_s22 = smov %s709_s23 }
 0x145   : > { %s902_s23 = smov %s815_s10  ;;  %s903_s24 = smov %s717_s25 }
 0x146   : > { %s904_s25 = smov %s906_s29  ;;  %18 = sbr.rel (!%p16_p5) target bundleno = 4 (0x4), region = 82 }
 0x14d   :  { %471 = vsyncpa [#allocation3], 1 }
 0x14e   :  { %473 = vsyncpa [#allocation3 + $0x1], 1 }

</bundles_post_ra>
